<compile_context>
chip_gen: v5e
topology: v5e:2x2
jax: 0.10.0
libtpu: 0.0.40
codegen_flags: <defaults>
</compile_context>

<pallas_src>
import math

import jax
import jax.numpy as jnp
from jax.experimental import pallas as pl
from jax.experimental.pallas import tpu as pltpu

_LANE = 128
_SUBLANE = 8
_WIDE_COLS = 512 * _LANE                 # 65536-wide lane-dense slab cap
_TARGET_TILE_BYTES = 8 * 1024 * 1024     # ~8 MiB tiles; 4x (in+out, dbl-buffered) ≈ 32 MiB
_VMEM_LIMIT_BYTES = 48 * 1024 * 1024     # headroom over the footprint; < v7x 64 MiB


def _identity_kernel(x_ref, o_ref):
    # Plain ref-to-ref copy with a fused cast when dtypes differ (int -> f32
    # promotion path). When dtypes match, astype is a no-op: no VALU work.
    o_ref[...] = x_ref[...].astype(o_ref.dtype)


def _plan_view(total, last_dim, itemsize):
    """Pick a zero-copy (rows, cols) 2-D view of the flat array plus a row tile."""
    if total % _LANE == 0:
        # Largest lane-dense (multiple-of-128) divisor of `total`, capped at the
        # wide slab -> unmasked stores + large contiguous DMAs, and NO padding.
        cols = _LANE * math.gcd(total // _LANE, _WIDE_COLS // _LANE)
    elif last_dim > 0 and total % last_dim == 0:
        # Unaligned totals: keep the natural last axis as the lane axis instead
        # of padding (removes the pad + slice HBM passes; stores may be masked).
        cols = last_dim
    else:
        cols = total  # odd 1-D size -> single row, single full-extent block
    rows = total // cols

    tile_rows = (_TARGET_TILE_BYTES // max(1, cols * itemsize)) // _SUBLANE * _SUBLANE
    tile_rows = max(_SUBLANE, tile_rows)
    if rows <= tile_rows:
        tile_rows = rows  # one full-extent block (exempt from the (8,128) rule)
    return rows, cols, tile_rows


def identical_map(x, *, force_copy=False):
    """Pallas implementation of `identical_map.forward`: y = x * 1.0."""
    # --- dtype handling (mirror PyTorch's promotion of `x * 1.0`) ---
    if x.dtype == jnp.bool_:
        # TODO(synk): bool blocks are promoted in the wrapper, not DMA'd through the kernel.
        return x.astype(jnp.float32)
    if jnp.issubdtype(x.dtype, jnp.complexfloating):
        # Pallas TPU cannot lower complex dtypes; x * 1.0 == x exactly.
        return x

    is_int = jnp.issubdtype(x.dtype, jnp.integer)
    out_dtype = jnp.float32 if is_int else x.dtype

    # Float path: x * 1.0 is bit-identical to x -> zero HBM traffic.
    if not is_int and not force_copy:
        return x

    if x.size == 0:
        return x.astype(out_dtype)

    if is_int and jnp.dtype(x.dtype).itemsize < 4:
        # Avoid sub-word packed-int tiling edge cases; rare path.
        x = x.astype(jnp.int32)

    orig_shape = x.shape
    flat = x.reshape(-1)                 # zero-copy view for contiguous arrays
    total = flat.size
    last_dim = int(orig_shape[-1]) if len(orig_shape) >= 1 else 1

    rows, cols, tile_rows = _plan_view(total, last_dim, jnp.dtype(flat.dtype).itemsize)
    x2d = flat.reshape(rows, cols)       # zero-copy: cols divides total by construction

    grid = (pl.cdiv(rows, tile_rows),)   # ragged last block is clipped by Pallas
    out = pl.pallas_call(
        _identity_kernel,
        out_shape=jax.ShapeDtypeStruct((rows, cols), out_dtype),
        grid_spec=pltpu.PrefetchScalarGridSpec(
            num_scalar_prefetch=0,
            grid=grid,
            in_specs=[pl.BlockSpec((tile_rows, cols), lambda i: (i, 0))],
            out_specs=pl.BlockSpec((tile_rows, cols), lambda i: (i, 0)),
        ),
        compiler_params=pltpu.CompilerParams(
            dimension_semantics=("parallel",),      # shard grid across v7x's 2 TCs
            vmem_limit_bytes=_VMEM_LIMIT_BYTES,     # covers 4x 8 MiB tiles + headroom
        ),
    )(x2d)

    return out.reshape(orig_shape)


if __name__ == "__main__":
    key = jax.random.PRNGKey(0)
    k1, k2, k3 = jax.random.split(key, 3)

    # 1) Default float path: bit-identical short-circuit (zero HBM traffic).
    x = jax.random.normal(k1, (2, 8, 32), dtype=jnp.float32)
    y = jax.block_until_ready(identical_map(x))
    assert y.shape == x.shape and y.dtype == x.dtype
    assert bool(jnp.all(y == x))

    # 2) Forced copy through the kernel: lane-dense divisor layout (512 elems).
    y_copy = jax.block_until_ready(identical_map(x, force_copy=True))
    assert y_copy.shape == x.shape and y_copy.dtype == x.dtype
    assert bool(jnp.all(y_copy == x))

    # 3) Unaligned bf16 shape: natural-last-axis layout, no pad / no slice passes.
    x2 = jax.random.normal(k2, (3, 50, 7), dtype=jnp.bfloat16)
    y2 = jax.block_until_ready(identical_map(x2, force_copy=True))
    assert y2.shape == x2.shape and y2.dtype == x2.dtype
    assert bool(jnp.all(y2 == x2))

    # 4) Integer input: PyTorch `x * 1.0` promotes to float32; cast fused in-kernel.
    xi = jax.random.randint(k3, (4, 9), -5, 5, dtype=jnp.int32)
    yi = jax.block_until_ready(identical_map(xi))
    assert yi.dtype == jnp.float32 and yi.shape == xi.shape
    assert bool(jnp.all(yi == xi.astype(jnp.float32)))

    print("KERNEL_OK")
</pallas_src>

<mosaic_0001>
module attributes {stable_mosaic.version = 11 : i64} {
  func.func @_identity_kernel(%arg0: i32, %arg1: memref<1x512xf32, #tpu.memory_space<vmem>>, %arg2: memref<1x512xf32, #tpu.memory_space<vmem>>) attributes {dimension_semantics = [#tpu.dimension_semantics<parallel>], iteration_bounds = array<i64: 1>, scalar_prefetch = 0 : i64, scratch_operands = 0 : i64, tpu.core_type = #tpu.core_type<tc>, window_params = [{transform_indices = @transform_0, window_bounds = array<i64: 1, 512>}, {transform_indices = @transform_1, window_bounds = array<i64: 1, 512>}]} {
    %c0 = arith.constant 0 : index
    %c0_0 = arith.constant 0 : index
    %0 = vector.load %arg1[%c0, %c0_0] : memref<1x512xf32, #tpu.memory_space<vmem>>, vector<1x512xf32>
    %c0_1 = arith.constant 0 : index
    %c0_2 = arith.constant 0 : index
    %1 = vector.load %arg2[%c0_1, %c0_2] : memref<1x512xf32, #tpu.memory_space<vmem>>, vector<1x512xf32>
    tpu.vector_store %arg2[%c0_1, %c0_2], %0 {strides = array<i32>} : memref<1x512xf32, #tpu.memory_space<vmem>>, vector<1x512xf32>,
    return
  }
  func.func @transform_0(%arg0: i32) -> (i32, i32) {
    %c0_i32 = arith.constant 0 : i32
    %c0_i32_0 = arith.constant 0 : i32
    return %arg0, %c0_i32 : i32, i32
  }
  func.func @transform_1(%arg0: i32) -> (i32, i32) {
    %c0_i32 = arith.constant 0 : i32
    %c0_i32_0 = arith.constant 0 : i32
    return %arg0, %c0_i32 : i32, i32
  }
}

</mosaic_0001>

<bundles_post_ra>
// kernel: tpu_custom_call.1
= control target key start
LH: loop header
LB: loop body
LE: loop exit
PB: predicated region body
PF: predicated region fallthrough
CT: control target
= control target key end

     0   :  { %6 = vsyncpa [#allocation3], 0  ;;  %s118_s0 = inlined_call_operand.hbm [shape: f32[1,512], index: 0, kind: input, shape index: {}]   ;;  %s119_s1 = inlined_call_operand.hbm [shape: f32[1,512], index: 1, kind: output, shape index: {}]  }
   0x1   :  { %7 = vsyncpa [#allocation4], 0  ;;  %s13_s8 = sshll.u32 %s118_s0, 4  ;;  %s100_s9 = smov [#allocation2]   ;;  %s14_s8 = int_to_ptr.hbm [resolvable:$true] %s13_s8 }
   0x2   :  { %s15_s10 = sshll.u32 %s100_s9, 4  ;;  %s16_s10 = int_to_ptr.vmem [resolvable:$true] %s15_s10 }
   0x3   :  { %18 = dma.hbm_to_vmem [thread:$0]  %s14_s8, 64, %s16_s10, [#allocation3]  }
   0x4   :  { %96 = dma.done.wait [#allocation3], 64  }
   0x5   :  { %97 = vsyncadd [#allocation3], 4294967232  ;;  %v24_v0 = vlaneseq  ;;  %s101_s11 = smov [#allocation5]   ;;  %s36_s15 = sshll.u32 %s119_s1, 4  ;;  %v23_v1 = vld [vmem:[#allocation2] sm:$0xf]  ;;  %s37_s15 = int_to_ptr.hbm [resolvable:$true] %s36_s15 }
   0x6   :  { %s34_s12 = sshll.u32 %s101_s11, 4  ;;  %s35_s12 = int_to_ptr.vmem [resolvable:$true] %s34_s12 }
   0x7   :  { %vm26_vm0 = vcmp.lt.s32.totalorder %v24_v0, 512 }
   0x8   :  { %28 = vst.msk [vmem:[#allocation5] sm:$0xf] %vm26_vm0, %v23_v1 }
   0x9   :  { %39 = dma.vmem_to_hbm [thread:$0]  %s35_s12, 64, %s37_s15, [#allocation4]  }
   0xa   :  { %98 = dma.done.wait [#allocation4], 64  }
   0xb   :  { %99 = vsyncadd [#allocation4], 4294967232 }
   0xc   :  { %44 = vsyncpa [#allocation3], 1 }
   0xd   :  { %45 = vsyncpa [#allocation4], 1 }

</bundles_post_ra>
